<compile_context>
chip_gen: v6e
topology: v6e:2x2x1
jax: 0.10.0
libtpu: 0.0.40
codegen_flags: <defaults>
</compile_context>

<pallas_src>
import functools

import jax
import jax.numpy as jnp
from jax import lax
from jax.experimental import pallas as pl
from jax.experimental.pallas import tpu as pltpu


def _round_up(x: int, m: int) -> int:
    return ((x + m - 1) // m) * m


# ----------------------------- kernel -------------------------------------

def _sum_reduce_kernel(x_ref, o_ref, acc_ref, *, scale, block_b, bpc,
                       total_rows, need_mask):
    """Streaming sum of all elements.

    grid = (num_splits, blocks_per_core):
      axis 0 ("parallel")  -> core split (megacore on v7x)
      axis 1 ("arbitrary") -> reduction over row blocks
    acc_ref: (8, N) f32 VMEM partial sums (pure VPU adds in the hot loop).
    o_ref:   (1, 1, 1) per-core scalar partial, written only at finalize.

    scale = 1.0       -> 'sum'
    scale = 1/(B*N)   -> 'mean'
    scale = 1/B       -> 'batchmean' (mean over dim0 then sum == total_sum / B)
    """
    c = pl.program_id(0)
    i = pl.program_id(1)

    @pl.when(i == 0)
    def _():
        acc_ref[...] = jnp.zeros_like(acc_ref)

    x = x_ref[...].astype(jnp.float32)
    if need_mask:
        # Mask rows outside the logical [0, total_rows) range (partial last block
        # and/or duplicated clamped blocks on the 2nd core).
        row0 = (c * bpc + i) * block_b
        rows = lax.broadcasted_iota(jnp.int32, x.shape, 0) + row0
        x = jnp.where(rows < total_rows, x, 0.0)

    # Lane-preserving partial sum: (block_b // 8) vreg adds per lane column, all VPU.
    acc_ref[...] += x.reshape(block_b // 8, 8, x.shape[-1]).sum(axis=0)

    @pl.when(i == pl.num_programs(1) - 1)
    def _():
        # Single cross-lane (XLU) reduction per core, once.
        o_ref[...] = (jnp.sum(acc_ref[...]) * scale).reshape(1, 1, 1)


# ----------------------------- wrapper ------------------------------------

def pallas_reduce(a: jax.Array, reduction: str) -> jax.Array:
    """Pallas implementation of rankers' reduce(a, reduction)."""
    if reduction == 'none':
        # Identity — avoid burning 2x HBM bandwidth on a copy.
        return a
    if reduction not in ('mean', 'sum', 'batchmean'):
        raise ValueError(f'Unknown reduction type: {reduction}')

    assert a.ndim >= 1
    B = a.shape[0]
    a2 = a.reshape(B, -1)           # valid for all three global reductions
    N = a2.shape[1]

    if reduction == 'mean':
        scale = 1.0 / float(a2.size)
    elif reduction == 'sum':
        scale = 1.0
    else:  # batchmean
        scale = 1.0 / float(B)

    # ---- tile sizing: ~4 MiB per input buffer (fits double-buffered in every
    # generation's default scoped VMEM: 16 MiB v5e, 32 MiB v6e/v7x), sublane aligned.
    bytes_per_row = max(1, N * a2.dtype.itemsize)
    budget_rows = max(8, ((4 << 20) // bytes_per_row) // 8 * 8)
    block_b = min(_round_up(B, 8), budget_rows)
    # TODO(synk): add a second (lane) grid axis for extremely wide rows where a
    # single 8-row stripe already exceeds the VMEM tile budget.

    blocks = pl.cdiv(B, block_b)

    # 2 TensorCores on v7x; serial (and cheap) elsewhere.  Skip the split when
    # there is only one block so we never do fully-masked duplicate work.
    num_splits = 2 if blocks >= 2 else 1
    bpc = pl.cdiv(blocks, num_splits)    # blocks per core
    need_mask = (num_splits * bpc * block_b) != B

    kernel = functools.partial(
        _sum_reduce_kernel,
        scale=float(scale), block_b=int(block_b), bpc=int(bpc),
        total_rows=int(B), need_mask=bool(need_mask))

    # Clamp logical block index so no DMA starts out of bounds; duplicated /
    # out-of-range blocks are zeroed by the in-kernel row mask.
    in_map = lambda c, i: (jnp.minimum(c * bpc + i, blocks - 1), 0)

    partials = pl.pallas_call(
        kernel,
        out_shape=jax.ShapeDtypeStruct((num_splits, 1, 1), jnp.float32),
        grid=(num_splits, bpc),
        in_specs=[pl.BlockSpec((block_b, N), in_map)],
        out_specs=pl.BlockSpec((1, 1, 1), lambda c, i: (c, 0, 0)),
        scratch_shapes=[pltpu.VMEM((8, N), jnp.float32)],
        compiler_params=pltpu.CompilerParams(
            dimension_semantics=("parallel", "arbitrary")),
    )(a2)

    return jnp.sum(partials).astype(a.dtype)


# ----------------------------- module -------------------------------------

class BaseLoss:
    """JAX/Pallas port of rankers BaseLoss. forward() is abstract, as in torch."""
    name = 'base'

    def __init__(self, reduction: str = 'mean') -> None:
        self.reduction = reduction

    def _reduce(self, a: jax.Array) -> jax.Array:
        return pallas_reduce(a, self.reduction)

    def forward(self, *args, **kwargs):
        raise NotImplementedError  # abstract in the reference module

    def __repr__(self):
        return self.name


# ----------------------------- demo / check -------------------------------

if __name__ == "__main__":
    key = jax.random.PRNGKey(0)
    ok = True

    # Small synthetic "loss matrices" (per-query per-doc losses); the second one
    # exercises the ragged (non-8/128-aligned) masking path.
    test_shapes = [(16, 128), (13, 96)]
    for idx, (B, N) in enumerate(test_shapes):
        a = jax.random.normal(jax.random.fold_in(key, idx), (B, N), dtype=jnp.float32)

        refs = {
            'mean': jnp.mean(a),
            'sum': jnp.sum(a),
            'batchmean': jnp.sum(jnp.mean(a, axis=0)),
            'none': a,
        }

        for reduction, ref in refs.items():
            loss_mod = BaseLoss(reduction=reduction)
            out = loss_mod._reduce(a)
            out = jax.block_until_ready(out)
            if not jnp.allclose(out, ref, atol=1e-4, rtol=1e-4):
                ok = False
                print(f"MISMATCH for shape={(B, N)} reduction={reduction}: "
                      f"got {out}, want {ref}")

    if ok:
        print("KERNEL_OK")
</pallas_src>

<mosaic_0001>
module attributes {stable_mosaic.version = 11 : i64} {
  func.func @_sum_reduce_kernel(%arg0: i32, %arg1: i32, %arg2: memref<16x128xf32, #tpu.memory_space<vmem>>, %arg3: memref<1x1x1xf32, #tpu.memory_space<vmem>>, %arg4: memref<8x128xf32, #tpu.memory_space<vmem>>) attributes {dimension_semantics = [#tpu.dimension_semantics<parallel>, #tpu.dimension_semantics<arbitrary>], iteration_bounds = array<i64: 1, 1>, scalar_prefetch = 0 : i64, scratch_operands = 1 : i64, tpu.core_type = #tpu.core_type<tc>, window_params = [{transform_indices = @transform_0, window_bounds = array<i64: 16, 128>}, {transform_indices = @transform_1, window_bounds = array<i64: 1, 1, 1>}]} {
    %c0_i32 = arith.constant 0 : i32
    %0 = arith.cmpi eq, %arg1, %c0_i32 : i32
    %1 = arith.extui %0 : i1 to i32
    %c0_i32_0 = arith.constant 0 : i32
    %2 = arith.cmpi ne, %1, %c0_i32_0 : i32
    scf.if %2 {
      %cst_8 = arith.constant 0.000000e+00 : f32
      %12 = vector.broadcast %cst_8 : f32 to vector<8x128xf32>
      %c0_9 = arith.constant 0 : index
      %c0_10 = arith.constant 0 : index
      %13 = vector.load %arg4[%c0_9, %c0_10] : memref<8x128xf32, #tpu.memory_space<vmem>>, vector<8x128xf32>
      tpu.vector_store %arg4[%c0_9, %c0_10], %12 {strides = array<i32>} : memref<8x128xf32, #tpu.memory_space<vmem>>, vector<8x128xf32>,
    } else {
    }
    %c0 = arith.constant 0 : index
    %c0_1 = arith.constant 0 : index
    %3 = vector.load %arg2[%c0, %c0_1] : memref<16x128xf32, #tpu.memory_space<vmem>>, vector<16x128xf32>
    %c0_2 = arith.constant 0 : index
    %c0_3 = arith.constant 0 : index
    %4 = vector.load %arg4[%c0_2, %c0_3] : memref<8x128xf32, #tpu.memory_space<vmem>>, vector<8x128xf32>
    %5 = vector.shape_cast %3 : vector<16x128xf32> to vector<2x8x128xf32>
    %cst = arith.constant dense<0.000000e+00> : vector<8x128xf32>
    %6 = vector.multi_reduction <add>, %5, %cst [0] : vector<2x8x128xf32> to vector<8x128xf32>
    %7 = arith.addf %4, %6 : vector<8x128xf32>
    %c0_4 = arith.constant 0 : index
    %c0_5 = arith.constant 0 : index
    %8 = vector.load %arg4[%c0_4, %c0_5] : memref<8x128xf32, #tpu.memory_space<vmem>>, vector<8x128xf32>
    tpu.vector_store %arg4[%c0_4, %c0_5], %7 {strides = array<i32>} : memref<8x128xf32, #tpu.memory_space<vmem>>, vector<8x128xf32>,
    %c0_i32_6 = arith.constant 0 : i32
    %9 = arith.cmpi eq, %arg1, %c0_i32_6 : i32
    %10 = arith.extui %9 : i1 to i32
    %c0_i32_7 = arith.constant 0 : i32
    %11 = arith.cmpi ne, %10, %c0_i32_7 : i32
    scf.if %11 {
      %c0_8 = arith.constant 0 : index
      %c0_9 = arith.constant 0 : index
      %12 = vector.load %arg4[%c0_8, %c0_9] : memref<8x128xf32, #tpu.memory_space<vmem>>, vector<8x128xf32>
      %13 = vector.shape_cast %12 : vector<8x128xf32> to vector<1x8x128xf32>
      %cst_10 = arith.constant dense<0.000000e+00> : vector<1xf32>
      %14 = vector.multi_reduction <add>, %13, %cst_10 [1, 2] : vector<1x8x128xf32> to vector<1xf32>
      %15 = vector.shape_cast %14 : vector<1xf32> to vector<1x1x1xf32>
      %16 = vector.extract %15[0, 0, 0] : f32 from vector<1x1x1xf32>
      %cst_11 = arith.constant 4.8828125E-4 : f32
      %17 = arith.mulf %16, %cst_11 : f32
      %18 = vector.broadcast %17 : f32 to vector<1x1x1xf32>
      %c0_12 = arith.constant 0 : index
      %c0_13 = arith.constant 0 : index
      %c0_14 = arith.constant 0 : index
      %19 = vector.load %arg3[%c0_12, %c0_13, %c0_14] : memref<1x1x1xf32, #tpu.memory_space<vmem>>, vector<1x1x1xf32>
      tpu.vector_store %arg3[%c0_12, %c0_13, %c0_14], %18 {strides = array<i32>} : memref<1x1x1xf32, #tpu.memory_space<vmem>>, vector<1x1x1xf32>,
    } else {
    }
    return
  }
  func.func @transform_0(%arg0: i32, %arg1: i32) -> (i32, i32) {
    %c1_i32 = arith.constant 1 : i32
    %0 = arith.muli %arg0, %c1_i32 : i32
    %1 = arith.addi %0, %arg1 : i32
    %c0_i32 = arith.constant 0 : i32
    %2 = arith.minsi %1, %c0_i32 : i32
    %c0_i32_0 = arith.constant 0 : i32
    %c0_i32_1 = arith.constant 0 : i32
    return %2, %c0_i32_0 : i32, i32
  }
  func.func @transform_1(%arg0: i32, %arg1: i32) -> (i32, i32, i32) {
    %c0_i32 = arith.constant 0 : i32
    %c0_i32_0 = arith.constant 0 : i32
    %c0_i32_1 = arith.constant 0 : i32
    return %arg0, %c0_i32, %c0_i32_0 : i32, i32, i32
  }
}

</mosaic_0001>

<bundles_post_ra>
// kernel: tpu_custom_call.1
= control target key start
LH: loop header
LB: loop body
LE: loop exit
PB: predicated region body
PF: predicated region fallthrough
CT: control target
= control target key end

     0   :  { %6 = vsyncpa [#allocation4], 0  ;;  %s148_s0 = inlined_call_operand.hbm [shape: f32[16,128], index: 0, kind: input, shape index: {}]   ;;  %s149_s1 = inlined_call_operand.hbm [shape: f32[1,1,1], index: 1, kind: output, shape index: {}]  }
   0x1   :  { %7 = vsyncpa [#allocation5], 0  ;;  %s128_s6 = smov [#allocation3]  }
   0x2   :  { %s19_s7 = sshll.u32 %s128_s6, 4  ;;  %s20_s7 = int_to_ptr.vmem [resolvable:$true] %s19_s7 }
   0x3   :  { %s92_s8 = scalar_lea.vmem %s20_s7, 256  ;;  %p97_p1 = scmp.lt.s32.totalorder %s20_s7, %s20_s7 }
   0x4   :  { %p93_p0 = scmp.ne.s32.totalorder %s20_s7, %s92_s8  ;;  %p98_p2 = scmp.lt.s32.totalorder %s92_s8, %s92_s8 }
   0x6   :  { %p99_p3 = por %p98_p2, %p97_p1 }
   0x8   :  { %p100_p4 = pnand %p99_p3, %p93_p0 }
   0xa   :  { %103 = shalt.err (!%p100_p4)
}
   0xb   :  { %s129_s9 = smov 128   ;;  %s130_s10 = smov 8  }
   0xc   :  { %25 = dma.hbm_to_vmem [thread:$0]  %s148_s0, 256, %s20_s7, [#allocation4], %s129_s9, %s129_s9, %s130_s10  }
   0xd   :  { %124 = dma.done.wait [#allocation4], 256  }
   0xe   :  { %125 = vsyncadd [#allocation4], 4294967040  ;;  %v38_v0 = vld [vmem:[#allocation3] sm:$0xff]  ;;  %v39_v1 = vld [vmem:[#allocation3 + $0x8] sm:$0xff]  ;;  %s131_s13 = smov [#allocation6]   ;;  %vm59_vm0 = vcmask 0  }
   0xf   :  { %v41_v2 = vadd.f32 %v39_v1, %v38_v0  ;;  %s67_s14 = sshll.u32 %s131_s13, 4  ;;  %s68_s14 = int_to_ptr.vmem [resolvable:$true] %s67_s14 }
  0x10   :  { %s104_s0 = scalar_lea.vmem %s68_s14, 16  ;;  %s108_s17 = scalar_lea.vmem %s68_s14, 32 }
  0x11   :  { %48 = vadd.xlane.f32.xlu0 %v41_v2  ;;  %p105_p5 = scmp.ne.s32.totalorder %s68_s14, %s104_s0  ;;  %p109_p6 = scmp.lt.s32.totalorder %s68_s14, %s68_s14 }
  0x12   :  { %p110_p7 = scmp.lt.s32.totalorder %s108_s17, %s104_s0 }
  0x14   :  { %p111_p8 = por %p110_p7, %p109_p6 }
  0x16   :  { %p112_p9 = pnand %p111_p8, %p105_p5 }
  0x9a   :  { %v49_v3 = vpop.xlane.xlu0 %48 }
  0x9b   :  { %v50_v4 = vrot.slane %v49_v3, 4 }
  0x9d   :  { %v51_v5 = vadd.f32 %v50_v4, %v49_v3 }
  0x9f   :  { %v52_v6 = vrot.slane %v51_v5, 2 }
  0xa1   :  { %v53_v7 = vadd.f32 %v52_v6, %v51_v5 }
  0xa3   :  { %v54_v8 = vrot.slane %v53_v7, 1 }
  0xa5   :  { %v55_v9 = vadd.f32 %v54_v8, %v53_v7 }
  0xa7   :  { %78 = vpush %v55_v9 }
  0xd8   :  { %s79_s15 = spop %78 }
  0xd9   :  { %s57_s16 = smul.f32 0.00048828125, %s79_s15 }
  0xdb   :  { %v58_v10 = vstv %s57_s16 }
  0xdc   :  { %60 = vst.msk [vmem:[#allocation6] sm:$0x1] %vm59_vm0, %v58_v10 }
  0xdd   :  { %115 = shalt.err (!%p112_p9)
}
  0xde   :  { %70 = dma.vmem_to_hbm [thread:$0]  %s68_s14, 16, %s149_s1, [#allocation5]  }
  0xdf   :  { %126 = dma.done.wait [#allocation5], 16  }
  0xe0   :  { %127 = vsyncadd [#allocation5], 4294967280 }
  0xe1   :  { %74 = vsyncpa [#allocation4], 1 }
  0xe2   :  { %75 = vsyncpa [#allocation5], 1 }

</bundles_post_ra>
